<compile_context>
chip_gen: v7x
topology: tpu7x:2x2x1
jax: 0.10.0
libtpu: 0.0.40
codegen_flags: <defaults>
</compile_context>

<pallas_src>
import jax
import jax.numpy as jnp
from jax import lax
from jax.experimental import pallas as pl
from jax.experimental.pallas import tpu as pltpu

LN_EPS = 1e-5
FEATURES = 4
LANES = 128
GROUPS = LANES // FEATURES          # 32 logical rows packed per lane-row
INV_SQRT2 = 0.7071067811865476


def _bert_ln_gelu_kernel(x_ref, wbd_ref, avg_ref, p_ref, o_ref):
    # x_ref:   (TM, 128)  packed input (32 groups of 4 features per lane-row)
    # wbd_ref: (128, 128) block-diagonal of W^T (32 copies on the diagonal)
    # avg_ref: (128, 128) block-diagonal of 0.25*ones(4,4) -> per-group mean bcast
    # p_ref:   (3, 128)   tiled [bias; gamma; beta]
    x = x_ref[...].astype(jnp.float32)
    params = p_ref[...].astype(jnp.float32)
    bias, gamma, beta = params[0:1, :], params[1:2, :], params[2:3, :]

    # Linear(4,4): packed @ block_diag(W^T) + tiled bias  (matches x @ W^T + b)
    y = jnp.dot(x, wbd_ref[...], preferred_element_type=jnp.float32) + bias

    # LayerNorm over each 4-lane group (biased variance, eps inside rsqrt).
    # Group reductions stay lane-dense via the block-diagonal averaging matmul.
    mean = jnp.dot(y, avg_ref[...], preferred_element_type=jnp.float32)
    c = y - mean
    var = jnp.dot(c * c, avg_ref[...], preferred_element_type=jnp.float32)
    y_ln = c * lax.rsqrt(var + LN_EPS) * gamma + beta

    # Exact (erf) GELU, matching torch.nn.GELU(approximate='none')
    out = 0.5 * y_ln * (1.0 + lax.erf(y_ln * INV_SQRT2))

    o_ref[...] = out.astype(o_ref.dtype)


def bert_ln_gelu(x, w, b, gamma, beta, *, tile_rows=1024):
    """x: (..., 4); w: (4, 4) torch layout (out, in); b, gamma, beta: (4,)."""
    assert x.shape[-1] == FEATURES
    orig_shape = x.shape
    total = x.size

    # --- lane-dense repack: (..., 4) -> (P_pad, 128), row-major, tail padded ---
    p_rows = pl.cdiv(total, LANES)                     # packed rows needed
    tm = min(tile_rows, ((p_rows + 7) // 8) * 8)       # sublane-aligned tile
    p_pad = ((p_rows + tm - 1) // tm) * tm             # whole number of tiles
    flat = x.reshape(-1)
    pad = p_pad * LANES - total
    if pad:
        flat = jnp.pad(flat, (0, pad))                 # zero rows are numerically safe
    x_packed = flat.reshape(p_pad, LANES)

    # --- parameter prep, hoisted out of the kernel (done once) ---
    eye = jnp.eye(GROUPS, dtype=jnp.float32)
    w_bd = jnp.kron(eye, w.astype(jnp.float32).T)                           # (128, 128)
    avg = jnp.kron(eye, jnp.full((FEATURES, FEATURES), 1.0 / FEATURES,
                                 dtype=jnp.float32))                        # (128, 128)
    params = jnp.stack([
        jnp.tile(b.astype(jnp.float32), GROUPS),
        jnp.tile(gamma.astype(jnp.float32), GROUPS),
        jnp.tile(beta.astype(jnp.float32), GROUPS),
    ])                                                                      # (3, 128)

    grid = (p_pad // tm,)
    out_packed = pl.pallas_call(
        _bert_ln_gelu_kernel,
        out_shape=jax.ShapeDtypeStruct((p_pad, LANES), x.dtype),
        grid=grid,
        in_specs=[
            pl.BlockSpec((tm, LANES), lambda i: (i, 0)),       # packed activations
            pl.BlockSpec((LANES, LANES), lambda i: (0, 0)),    # block-diag W^T
            pl.BlockSpec((LANES, LANES), lambda i: (0, 0)),    # block-diag averaging
            pl.BlockSpec((3, LANES), lambda i: (0, 0)),        # bias/gamma/beta
        ],
        out_specs=pl.BlockSpec((tm, LANES), lambda i: (i, 0)),
        compiler_params=pltpu.CompilerParams(
            dimension_semantics=("parallel",)),
    )(x_packed, w_bd, avg, params)

    return out_packed.reshape(-1)[:total].reshape(orig_shape)


def _reference(x, w, b, gamma, beta):
    y = jnp.einsum("...i,oi->...o", x, w) + b
    mean = jnp.mean(y, axis=-1, keepdims=True)
    var = jnp.mean((y - mean) ** 2, axis=-1, keepdims=True)
    y = (y - mean) / jnp.sqrt(var + LN_EPS) * gamma + beta
    return jax.nn.gelu(y, approximate=False)


if __name__ == "__main__":
    key = jax.random.PRNGKey(0)
    kx, kw, kb, kg, kbe, kx2 = jax.random.split(key, 6)

    # Deterministic synthetic parameters (shapes from the module's __init__)
    w = jax.random.normal(kw, (FEATURES, FEATURES), dtype=jnp.float32) * 0.5
    b = jax.random.normal(kb, (FEATURES,), dtype=jnp.float32) * 0.1
    gamma = 1.0 + 0.1 * jax.random.normal(kg, (FEATURES,), dtype=jnp.float32)
    beta = 0.1 * jax.random.normal(kbe, (FEATURES,), dtype=jnp.float32)

    # Small input consistent with the module: (batch=2, seq=8, hidden=4)
    x = jax.random.normal(kx, (2, 8, FEATURES), dtype=jnp.float32)
    out = jax.block_until_ready(bert_ln_gelu(x, w, b, gamma, beta))
    ref = _reference(x, w, b, gamma, beta)
    assert out.shape == x.shape
    assert jnp.allclose(out, ref, atol=3e-5, rtol=3e-5), float(jnp.max(jnp.abs(out - ref)))

    # Second shape exercising the multi-tile row grid (batch=64, seq=512, hidden=4)
    x2 = jax.random.normal(kx2, (64, 512, FEATURES), dtype=jnp.float32)
    out2 = jax.block_until_ready(bert_ln_gelu(x2, w, b, gamma, beta))
    ref2 = _reference(x2, w, b, gamma, beta)
    assert out2.shape == x2.shape
    assert jnp.allclose(out2, ref2, atol=3e-5, rtol=3e-5), float(jnp.max(jnp.abs(out2 - ref2)))

    print("KERNEL_OK")
</pallas_src>

<mosaic_0001>
module attributes {stable_mosaic.version = 11 : i64} {
  func.func @_bert_ln_gelu_kernel(%arg0: i32, %arg1: memref<8x128xf32, #tpu.memory_space<vmem>>, %arg2: memref<128x128xf32, #tpu.memory_space<vmem>>, %arg3: memref<128x128xf32, #tpu.memory_space<vmem>>, %arg4: memref<3x128xf32, #tpu.memory_space<vmem>>, %arg5: memref<8x128xf32, #tpu.memory_space<vmem>>) attributes {dimension_semantics = [#tpu.dimension_semantics<parallel>], iteration_bounds = array<i64: 1>, scalar_prefetch = 0 : i64, scratch_operands = 0 : i64, tpu.core_type = #tpu.core_type<tc>, window_params = [{transform_indices = @transform_0, window_bounds = array<i64: 8, 128>}, {pipeline_mode = #tpu.pipeline_mode<synchronous>, transform_indices = @transform_1, window_bounds = array<i64: 128, 128>}, {pipeline_mode = #tpu.pipeline_mode<synchronous>, transform_indices = @transform_2, window_bounds = array<i64: 128, 128>}, {pipeline_mode = #tpu.pipeline_mode<synchronous>, transform_indices = @transform_3, window_bounds = array<i64: 3, 128>}, {transform_indices = @transform_4, window_bounds = array<i64: 8, 128>}]} {
    %c0 = arith.constant 0 : index
    %c0_0 = arith.constant 0 : index
    %0 = vector.load %arg1[%c0, %c0_0] : memref<8x128xf32, #tpu.memory_space<vmem>>, vector<8x128xf32>
    %c0_1 = arith.constant 0 : index
    %c0_2 = arith.constant 0 : index
    %1 = vector.load %arg4[%c0_1, %c0_2] : memref<3x128xf32, #tpu.memory_space<vmem>>, vector<3x128xf32>
    %2 = vector.extract_strided_slice %1 {offsets = [0, 0], sizes = [1, 128], strides = [1, 1]} : vector<3x128xf32> to vector<1x128xf32>
    %3 = vector.extract_strided_slice %1 {offsets = [1, 0], sizes = [1, 128], strides = [1, 1]} : vector<3x128xf32> to vector<1x128xf32>
    %4 = vector.extract_strided_slice %1 {offsets = [2, 0], sizes = [1, 128], strides = [1, 1]} : vector<3x128xf32> to vector<1x128xf32>
    %c0_3 = arith.constant 0 : index
    %c0_4 = arith.constant 0 : index
    %5 = vector.load %arg2[%c0_3, %c0_4] : memref<128x128xf32, #tpu.memory_space<vmem>>, vector<128x128xf32>
    %cst = arith.constant dense<0.000000e+00> : vector<8x128xf32>
    %6 = tpu.matmul %0, %5, %cst {dimension_numbers = #tpu.dot_dimension_numbers<[1], [0], [0], [1], [0, 0, 1, 1], [], []>} : vector<8x128xf32>, vector<128x128xf32>, vector<8x128xf32> -> vector<8x128xf32>
    %7 = vector.broadcast %2 : vector<1x128xf32> to vector<8x128xf32>
    %8 = arith.addf %6, %7 : vector<8x128xf32>
    %c0_5 = arith.constant 0 : index
    %c0_6 = arith.constant 0 : index
    %9 = vector.load %arg3[%c0_5, %c0_6] : memref<128x128xf32, #tpu.memory_space<vmem>>, vector<128x128xf32>
    %cst_7 = arith.constant dense<0.000000e+00> : vector<8x128xf32>
    %10 = tpu.matmul %8, %9, %cst_7 {dimension_numbers = #tpu.dot_dimension_numbers<[1], [0], [0], [1], [0, 0, 1, 1], [], []>} : vector<8x128xf32>, vector<128x128xf32>, vector<8x128xf32> -> vector<8x128xf32>
    %11 = arith.subf %8, %10 : vector<8x128xf32>
    %12 = arith.mulf %11, %11 : vector<8x128xf32>
    %c0_8 = arith.constant 0 : index
    %c0_9 = arith.constant 0 : index
    %13 = vector.load %arg3[%c0_8, %c0_9] : memref<128x128xf32, #tpu.memory_space<vmem>>, vector<128x128xf32>
    %cst_10 = arith.constant dense<0.000000e+00> : vector<8x128xf32>
    %14 = tpu.matmul %12, %13, %cst_10 {dimension_numbers = #tpu.dot_dimension_numbers<[1], [0], [0], [1], [0, 0, 1, 1], [], []>} : vector<8x128xf32>, vector<128x128xf32>, vector<8x128xf32> -> vector<8x128xf32>
    %cst_11 = arith.constant 9.99999974E-6 : f32
    %15 = vector.broadcast %cst_11 : f32 to vector<8x128xf32>
    %16 = arith.addf %14, %15 : vector<8x128xf32>
    %17 = math.rsqrt %16 : vector<8x128xf32>
    %18 = arith.mulf %11, %17 : vector<8x128xf32>
    %19 = vector.broadcast %3 : vector<1x128xf32> to vector<8x128xf32>
    %20 = arith.mulf %18, %19 : vector<8x128xf32>
    %21 = vector.broadcast %4 : vector<1x128xf32> to vector<8x128xf32>
    %22 = arith.addf %20, %21 : vector<8x128xf32>
    %cst_12 = arith.constant 5.000000e-01 : f32
    %23 = vector.broadcast %cst_12 : f32 to vector<8x128xf32>
    %24 = arith.mulf %23, %22 : vector<8x128xf32>
    %cst_13 = arith.constant 0.707106769 : f32
    %25 = vector.broadcast %cst_13 : f32 to vector<8x128xf32>
    %26 = arith.mulf %22, %25 : vector<8x128xf32>
    %27 = math.erf %26 : vector<8x128xf32>
    %cst_14 = arith.constant 1.000000e+00 : f32
    %28 = vector.broadcast %cst_14 : f32 to vector<8x128xf32>
    %29 = arith.addf %28, %27 : vector<8x128xf32>
    %30 = arith.mulf %24, %29 : vector<8x128xf32>
    %c0_15 = arith.constant 0 : index
    %c0_16 = arith.constant 0 : index
    %31 = vector.load %arg5[%c0_15, %c0_16] : memref<8x128xf32, #tpu.memory_space<vmem>>, vector<8x128xf32>
    tpu.vector_store %arg5[%c0_15, %c0_16], %30 {strides = array<i32>} : memref<8x128xf32, #tpu.memory_space<vmem>>, vector<8x128xf32>,
    return
  }
  func.func @transform_0(%arg0: i32) -> (i32, i32) {
    %c0_i32 = arith.constant 0 : i32
    %c0_i32_0 = arith.constant 0 : i32
    return %arg0, %c0_i32 : i32, i32
  }
  func.func @transform_1(%arg0: i32) -> (i32, i32) {
    %c0_i32 = arith.constant 0 : i32
    %c0_i32_0 = arith.constant 0 : i32
    %c0_i32_1 = arith.constant 0 : i32
    return %c0_i32, %c0_i32_0 : i32, i32
  }
  func.func @transform_2(%arg0: i32) -> (i32, i32) {
    %c0_i32 = arith.constant 0 : i32
    %c0_i32_0 = arith.constant 0 : i32
    %c0_i32_1 = arith.constant 0 : i32
    return %c0_i32, %c0_i32_0 : i32, i32
  }
  func.func @transform_3(%arg0: i32) -> (i32, i32) {
    %c0_i32 = arith.constant 0 : i32
    %c0_i32_0 = arith.constant 0 : i32
    %c0_i32_1 = arith.constant 0 : i32
    return %c0_i32, %c0_i32_0 : i32, i32
  }
  func.func @transform_4(%arg0: i32) -> (i32, i32) {
    %c0_i32 = arith.constant 0 : i32
    %c0_i32_0 = arith.constant 0 : i32
    return %arg0, %c0_i32 : i32, i32
  }
}

</mosaic_0001>

<bundles_post_ra>
// kernel: tpu_custom_call.1
= control target key start
LH: loop header
LB: loop body
LE: loop exit
PB: predicated region body
PF: predicated region fallthrough
CT: control target
= control target key end

     0   :  { %9 = vsyncpa [#allocation3], 0  ;;  %s797_s0 = inlined_call_operand.hbm [shape: f32[8,128], index: 0, kind: input, shape index: {}]   ;;  %s798_s1 = inlined_call_operand.hbm [shape: f32[128,128], index: 1, kind: input, shape index: {}]   ;;  %s799_s2 = inlined_call_operand.hbm [shape: f32[128,128], index: 2, kind: input, shape index: {}]   ;;  %s800_s3 = inlined_call_operand.vmem [shape: f32[3,128], index: 3, kind: input, shape index: {}]   ;;  %s801_s4 = inlined_call_operand.hbm [shape: f32[8,128], index: 4, kind: output, shape index: {}]  }
   0x1   :  { %10 = vsyncpa [#allocation6], 0 }
   0x2   :  { %11 = vsyncpa [#allocation4], 0  ;;  %s676_s15 = smov [#allocation5]   ;;  %s582_s19 = scalar_lea.hbm %s798_s1, 2048 }
   0x3   :  { %s27_s16 = sshll.u32 %s676_s15, 4  ;;  %p583_p0 = scmp.ne.s32.totalorder %s798_s1, %s582_s19  ;;  %s28_s16 = int_to_ptr.vmem [resolvable:$true] %s27_s16 }
   0x4   :  { %p586_p1 = scmp.lt.u32.totalorder %s582_s19, %s798_s1 }
   0x6   :  { %p588_p2 = pnand %p586_p1, %p583_p0 }
   0x8   :  { %591 = shalt.err (!%p588_p2)
}
   0x9   :  { %s592_s24 = scalar_lea.vmem %s28_s16, 2048  ;;  %p597_p4 = scmp.lt.s32.totalorder %s28_s16, %s28_s16 }
   0xa   :  { %p593_p3 = scmp.ne.s32.totalorder %s28_s16, %s592_s24  ;;  %p598_p5 = scmp.lt.s32.totalorder %s592_s24, %s592_s24 }
   0xc   :  { %p599_p6 = por %p598_p5, %p597_p4 }
   0xe   :  { %p600_p7 = pnand %p599_p6, %p593_p3 }
  0x10   :  { %603 = shalt.err (!%p600_p7)
}
  0x11   :  { %s677_s25 = smov 128   ;;  %s678_s26 = smov 8  }
  0x12   :  { %33 = dma.hbm_to_vmem [thread:$0]  %s798_s1, 2048, %s28_s16, [#allocation6], %s677_s25, %s677_s25, %s678_s26  }
  0x13   :  { %s679_s29 = smov [#allocation2]   ;;  %s680_s5 = smov [#allocation7]  }
  0x14   :  { %s18_s30 = sshll.u32 %s679_s29, 4  ;;  %s39_s6 = sshll.u32 %s680_s5, 4  ;;  %s19_s30 = int_to_ptr.vmem [resolvable:$true] %s18_s30  ;;  %s40_s6 = int_to_ptr.vmem [resolvable:$true] %s39_s6 }
  0x15   :  { %s604_s9 = scalar_lea.hbm %s797_s0, 128 }
  0x16   :  { %p605_p8 = scmp.ne.s32.totalorder %s797_s0, %s604_s9  ;;  %p608_p9 = scmp.lt.u32.totalorder %s604_s9, %s797_s0 }
  0x18   :  { %p610_p10 = pnand %p608_p9, %p605_p8 }
  0x1a   :  { %613 = shalt.err (!%p610_p10)
}
  0x1b   :  { %s614_s1 = scalar_lea.vmem %s19_s30, 128  ;;  %p619_p12 = scmp.lt.s32.totalorder %s19_s30, %s19_s30 }
  0x1c   :  { %p615_p11 = scmp.ne.s32.totalorder %s19_s30, %s614_s1  ;;  %p620_p13 = scmp.lt.s32.totalorder %s614_s1, %s614_s1 }
  0x1e   :  { %p621_p0 = por %p620_p13, %p619_p12 }
  0x20   :  { %p622_p1 = pnand %p621_p0, %p615_p11 }
  0x22   :  { %625 = shalt.err (!%p622_p1)
}
  0x23   :  { %21 = dma.hbm_to_vmem [thread:$0]  %s797_s0, 128, %s19_s30, [#allocation3]  }
  0x24   :  { %s626_s18 = scalar_lea.hbm %s799_s2, 2048 }
  0x25   :  { %p627_p2 = scmp.ne.s32.totalorder %s799_s2, %s626_s18  ;;  %p630_p3 = scmp.lt.u32.totalorder %s626_s18, %s799_s2 }
  0x27   :  { %p632_p4 = pnand %p630_p3, %p627_p2 }
  0x29   :  { %635 = shalt.err (!%p632_p4)
}
  0x2a   :  { %s636_s23 = scalar_lea.vmem %s40_s6, 2048  ;;  %p641_p6 = scmp.lt.s32.totalorder %s40_s6, %s40_s6 }
  0x2b   :  { %p637_p5 = scmp.ne.s32.totalorder %s40_s6, %s636_s23  ;;  %p642_p7 = scmp.lt.s32.totalorder %s636_s23, %s636_s23 }
  0x2d   :  { %p643_p8 = por %p642_p7, %p641_p6 }
  0x2f   :  { %p644_p9 = pnand %p643_p8, %p637_p5 }
  0x31   :  { %647 = shalt.err (!%p644_p9)
}
  0x32   :  { %45 = dma.hbm_to_vmem [thread:$0]  %s799_s2, 2048, %s40_s6, [#allocation6], %s677_s25, %s677_s25, %s678_s26  }
  0x33   :  { %670 = dma.done.wait [#allocation3], 128  }
  0x34   :  { %671 = vsyncadd [#allocation3], 4294967168 }
  0x35   :  { %672 = dma.done.wait [#allocation6], 4096  }
  0x36   :  { %673 = vsyncadd [#allocation6], 4294963200  ;;  %v681_v0 = vmov 0.0|0.0   ;;  %vm682_vm0 = vmmov 0   ;;  %v683_v1 = vmov 0.0   ;;  %v59_v2 = vld [vmem:[#allocation5] sm:$0xff]  ;;  %v75_v51 = vlaneseq }
  0x37   :  { %497 = vmatprep.subr.bf16.mxu0 %v681_v0  ;;  %424 = vmatprep.mubr.msk.f32.mxu0 %vm682_vm0, %v683_v1  ;;  %v60_v3 = vld [vmem:[#allocation5 + $0x8] sm:$0xff]  ;;  %v61_v4 = vld [vmem:[#allocation5 + $0x10] sm:$0xff]  ;;  %v62_v6 = vld [vmem:[#allocation5 + $0x18] sm:$0xff] }
  0x38   :  { %521 = vmatprep.subr.bf16.mxu1 %v681_v0  ;;  %459 = vmatprep.mubr.msk.f32.mxu1 %vm682_vm0, %v683_v1  ;;  %v498_v5 = vpack.c.bf16 %v60_v3, %v59_v2  ;;  %v501_v7 = vpack.c.bf16 %v62_v6, %v61_v4  ;;  %v63_v8 = vld [vmem:[#allocation5 + $0x20] sm:$0xff]  ;;  %v64_v9 = vld [vmem:[#allocation5 + $0x28] sm:$0xff]  ;;  %v151_v12 = vld [vmem:[#allocation7 + $0x10] sm:$0xff]  ;;  %v76_v52 = vshrl.u32 %v75_v51, 7 }
  0x39   :  { %v149_v10 = vld [vmem:[#allocation7] sm:$0xff]  ;;  %v150_v11 = vld [vmem:[#allocation7 + $0x8] sm:$0xff]  ;;  %v152_v13 = vld [vmem:[#allocation7 + $0x18] sm:$0xff]  ;;  %v504_v14 = vpack.c.bf16 %v64_v9, %v63_v8 }
  0x3a   :  { %499 = vmatpush3.bf16.msra.mxu0 %v498_v5  ;;  %v522_v15 = vpack.c.bf16 %v150_v11, %v149_v10  ;;  %v65_v16 = vld [vmem:[#allocation5 + $0x30] sm:$0xff]  ;;  %v66_v17 = vld [vmem:[#allocation5 + $0x38] sm:$0xff]  ;;  %v525_v18 = vpack.c.bf16 %v152_v13, %v151_v12  ;;  %v153_v19 = vld [vmem:[#allocation7 + $0x20] sm:$0xff]  ;;  %v77_v53 = vsub.s32 0, %v76_v52  ;;  %v311_v2 = vsub.s32 1, %v76_v52 }
  0x3b   :  { %500 = vmatprep.subr.bf16.mxu0 %v681_v0  ;;  %v154_v20 = vld [vmem:[#allocation7 + $0x28] sm:$0xff]  ;;  %v507_v21 = vpack.c.bf16 %v66_v17, %v65_v16  ;;  %v67_v22 = vld [vmem:[#allocation5 + $0x40] sm:$0xff]  ;;  %v155_v25 = vld [vmem:[#allocation7 + $0x30] sm:$0xff]  ;;  %v316_v3 = vsub.s32 2, %v76_v52 }
  0x3c   :  { %523 = vmatpush3.bf16.msra.mxu1 %v522_v15  ;;  %v68_v23 = vld [vmem:[#allocation5 + $0x48] sm:$0xff]  ;;  %v528_v24 = vpack.c.bf16 %v154_v20, %v153_v19  ;;  %v156_v26 = vld [vmem:[#allocation7 + $0x38] sm:$0xff]  ;;  %v69_v28 = vld [vmem:[#allocation5 + $0x50] sm:$0xff] }
  0x3d   :  { %524 = vmatprep.subr.bf16.mxu1 %v681_v0  ;;  %v510_v27 = vpack.c.bf16 %v68_v23, %v67_v22  ;;  %v70_v29 = vld [vmem:[#allocation5 + $0x58] sm:$0xff]  ;;  %v531_v30 = vpack.c.bf16 %v156_v26, %v155_v25  ;;  %v157_v31 = vld [vmem:[#allocation7 + $0x40] sm:$0xff]  ;;  %v158_v32 = vld [vmem:[#allocation7 + $0x48] sm:$0xff] }
  0x3e   :  { %502 = vmatpush3.bf16.msra.mxu0 %v501_v7  ;;  %v513_v33 = vpack.c.bf16 %v70_v29, %v69_v28  ;;  %v71_v34 = vld [vmem:[#allocation5 + $0x60] sm:$0xff]  ;;  %v72_v35 = vld [vmem:[#allocation5 + $0x68] sm:$0xff]  ;;  %v534_v36 = vpack.c.bf16 %v158_v32, %v157_v31  ;;  %v159_v37 = vld [vmem:[#allocation7 + $0x50] sm:$0xff] }
  0x3f   :  { %503 = vmatprep.subr.bf16.mxu0 %v681_v0  ;;  %v160_v38 = vld [vmem:[#allocation7 + $0x58] sm:$0xff]  ;;  %v516_v39 = vpack.c.bf16 %v72_v35, %v71_v34  ;;  %v73_v40 = vld [vmem:[#allocation5 + $0x70] sm:$0xff]  ;;  %v161_v43 = vld [vmem:[#allocation7 + $0x60] sm:$0xff] }
  0x40   :  { %526 = vmatpush3.bf16.msra.mxu1 %v525_v18  ;;  %v74_v41 = vld [vmem:[#allocation5 + $0x78] sm:$0xff]  ;;  %v537_v42 = vpack.c.bf16 %v160_v38, %v159_v37  ;;  %v162_v44 = vld [vmem:[#allocation7 + $0x68] sm:$0xff]  ;;  %v163_v48 = vld [vmem:[#allocation7 + $0x70] sm:$0xff] }
  0x41   :  { %527 = vmatprep.subr.bf16.mxu1 %v681_v0  ;;  %v519_v45 = vpack.c.bf16 %v74_v41, %v73_v40  ;;  %v540_v46 = vpack.c.bf16 %v162_v44, %v161_v43  ;;  %v57_v47 = vld [vmem:[#allocation2] sm:$0xff] }
  0x42   :  { %505 = vmatpush3.bf16.msra.mxu0 %v504_v14  ;;  %v164_v49 = vld [vmem:[#allocation7 + $0x78] sm:$0xff] }
  0x43   :  { %506 = vmatprep.subr.bf16.mxu0 %v681_v0  ;;  %v543_v50 = vpack.c.bf16 %v164_v49, %v163_v48  ;;  %v58_v54 = vld [vmem:[%s800_s3] sm:$0x7]  ;;  %s684_s3 = smov [#allocation8]  }
  0x44   :  { %529 = vmatpush3.bf16.msra.mxu1 %v528_v24  ;;  %v78_v55 = vrot.slane %v58_v54, %v77_v53  ;;  %v312_v4 = vrot.slane %v58_v54, %v311_v2  ;;  %v317_v6 = vrot.slane %v58_v54, %v316_v3  ;;  %s331_s26 = sshll.u32 %s684_s3, 4  ;;  %s332_s26 = int_to_ptr.vmem [resolvable:$true] %s331_s26 }
  0x45   :  { %530 = vmatprep.subr.bf16.mxu1 %v681_v0  ;;  %s648_s27 = scalar_lea.vmem %s332_s26, 128  ;;  %p653_p11 = scmp.lt.s32.totalorder %s332_s26, %s332_s26 }
  0x46   :  { %508 = vmatpush3.bf16.msra.mxu0 %v507_v21  ;;  %p649_p10 = scmp.ne.s32.totalorder %s332_s26, %s648_s27  ;;  %p654_p12 = scmp.lt.s32.totalorder %s648_s27, %s648_s27 }
  0x47   :  { %509 = vmatprep.subr.bf16.mxu0 %v681_v0 }
  0x48   :  { %532 = vmatpush3.bf16.msra.mxu1 %v531_v30  ;;  %p655_p13 = por %p654_p12, %p653_p11 }
  0x49   :  { %533 = vmatprep.subr.bf16.mxu1 %v681_v0 }
  0x4a   :  { %511 = vmatpush3.bf16.msra.mxu0 %v510_v27  ;;  %p656_p0 = pnand %p655_p13, %p649_p10 }
  0x4b   :  { %512 = vmatprep.subr.bf16.mxu0 %v681_v0 }
  0x4c   :  { %535 = vmatpush3.bf16.msra.mxu1 %v534_v36 }
  0x4d   :  { %536 = vmatprep.subr.bf16.mxu1 %v681_v0 }
  0x4e   :  { %514 = vmatpush3.bf16.msra.mxu0 %v513_v33 }
  0x4f   :  { %515 = vmatprep.subr.bf16.mxu0 %v681_v0 }
  0x50   :  { %538 = vmatpush3.bf16.msra.mxu1 %v537_v42 }
  0x51   :  { %539 = vmatprep.subr.bf16.mxu1 %v681_v0 }
  0x52   :  { %517 = vmatpush3.bf16.msra.mxu0 %v516_v39 }
  0x53   :  { %518 = vmatprep.subr.bf16.mxu0 %v681_v0 }
  0x54   :  { %541 = vmatpush3.bf16.msra.mxu1 %v540_v46 }
  0x55   :  { %542 = vmatprep.subr.bf16.mxu1 %v681_v0 }
  0x56   :  { %520 = vmatpush3.bf16.msra.mxu0 %v519_v45 }
  0x57   :  { %545 = vmatprep.subr.bf16.mxu0 %v681_v0 }
  0x58   :  { %544 = vmatpush3.bf16.msra.mxu1 %v543_v50 }
  0x59   :  { %425 = vmatmul.mubr.f32.vlgmr.msra.gmra.mrb[0].mxu0 %v57_v47 }
  0x5a   :  { %547 = vmatpush3.bf16.msra.mxu0 %v522_v15  ;;  %494 = vmatprep.mubr.msk.f32.mxu0 %vm682_vm0, %v683_v1 }
  0x5b   :  { %548 = vmatprep.subr.bf16.mxu0 %v681_v0 }
  0x5e   :  { %550 = vmatpush3.bf16.msra.mxu0 %v525_v18 }
  0x5f   :  { %551 = vmatprep.subr.bf16.mxu0 %v681_v0 }
  0x62   :  { %553 = vmatpush3.bf16.msra.mxu0 %v528_v24 }
  0x63   :  { %554 = vmatprep.subr.bf16.mxu0 %v681_v0 }
  0x66   :  { %556 = vmatpush3.bf16.msra.mxu0 %v531_v30 }
  0x67   :  { %557 = vmatprep.subr.bf16.mxu0 %v681_v0 }
  0x6a   :  { %559 = vmatpush3.bf16.msra.mxu0 %v534_v36 }
  0x6b   :  { %560 = vmatprep.subr.bf16.mxu0 %v681_v0 }
  0x6e   :  { %562 = vmatpush3.bf16.msra.mxu0 %v537_v42 }
  0x6f   :  { %563 = vmatprep.subr.bf16.mxu0 %v681_v0 }
  0x72   :  { %565 = vmatpush3.bf16.msra.mxu0 %v540_v46 }
  0x73   :  { %566 = vmatprep.subr.bf16.mxu0 %v681_v0 }
  0x76   :  { %568 = vmatpush3.bf16.msra.mxu0 %v543_v50 }
 0x12c   :  { %v145_v56 = vpop.f32.mrb[0].mxu0 }
 0x12d   :  { %v146_v57 = vadd.f32 %v145_v56, %v78_v55  ;;  %v426_v58 = vpop.f32.mrb[1].mxu0 }
 0x12f   :  { %460 = vmatmul.mubr.f32.vlgmr.msra.gmra.mrb[0].mxu1 %v146_v57 }
 0x202   :  { %v231_v59 = vpop.f32.mrb[0].mxu1 }
 0x203   :  { %v235_v60 = vsub.f32 %v146_v57, %v231_v59  ;;  %v461_v61 = vpop.f32.mrb[1].mxu1 }
 0x205   :  { %v236_v62 = vmul.f32 %v235_v60, %v235_v60 }
 0x207   :  { %495 = vmatmul.mubr.f32.vlgmr.msra.gmra.mrb[2].mxu0 %v236_v62 }
 0x2da   :  { %v303_v63 = vpop.f32.mrb[2].mxu0 }
 0x2db   :  { %v304_v0 = vadd.f32 1e-05, %v303_v63  ;;  %v496_v1 = vpop.f32.mrb[3].mxu0 }
 0x2dd   :  { %578 = vrsqrt.f32 %v304_v0 }
 0x2e7   :  { %v579_v5 = vpop.eup %578 }
 0x2e8   :  { %v308_v7 = vmul.f32 %v579_v5, %v235_v60 }
 0x2ea   :  { %v313_v8 = vmul.f32 %v312_v4, %v308_v7 }
 0x2ec   :  { %v318_v9 = vadd.f32 %v317_v6, %v313_v8 }
 0x2ee   :  { %v320_v10 = vmul.f32 0.70710677, %v318_v9  ;;  %v319_v12 = vmul.f32 0.5, %v318_v9 }
 0x2f0   :  { %580 = verf.f32 %v320_v10 }
 0x2fa   :  { %v581_v11 = vpop.eup %580 }
 0x2fb   :  { %v322_v13 = vadd.f32 1.0, %v581_v11 }
 0x2fd   :  { %v323_v14 = vmul.f32 %v322_v13, %v319_v12 }
 0x2ff   :  { %324 = vst [vmem:[#allocation8] sm:$0xff] %v323_v14 }
 0x300   :  { %659 = shalt.err (!%p656_p0)
}
 0x301   :  { %s660_s30 = scalar_lea.hbm %s801_s4, 128 }
 0x302   :  { %p661_p1 = scmp.ne.s32.totalorder %s801_s4, %s660_s30  ;;  %p664_p2 = scmp.lt.u32.totalorder %s660_s30, %s801_s4 }
 0x304   :  { %p666_p3 = pnand %p664_p2, %p661_p1 }
 0x306   :  { %669 = shalt.err (!%p666_p3)
}
 0x307   :  { %334 = dma.vmem_to_hbm [thread:$0]  %s332_s26, 128, %s801_s4, [#allocation4]  }
 0x308   :  { %674 = dma.done.wait [#allocation4], 128  }
 0x309   :  { %675 = vsyncadd [#allocation4], 4294967168 }
 0x30a   :  { %338 = vsyncpa [#allocation3], 1 }
 0x30b   :  { %339 = vsyncpa [#allocation6], 1 }
 0x30c   :  { %340 = vsyncpa [#allocation4], 1 }

</bundles_post_ra>
